<compile_context>
chip_gen: v7x
topology: tpu7x:2x2x1
jax: 0.10.0
libtpu: 0.0.40
codegen_flags: <defaults>
</compile_context>

<pallas_src>
import numpy as np
import jax
import jax.numpy as jnp
from jax.experimental import pallas as pl
from jax.experimental.pallas import tpu as pltpu


def debugnet3_kernel(w1_ref, w2_ref, x_ref, o_ref):
    """x_ref: (N, H*W) f32 in VMEM; w1_ref/w2_ref: (1,) f32 in SMEM."""
    w1 = w1_ref[0]
    w2 = w2_ref[0]
    y = jnp.maximum(x_ref[...] * w1, 0.0)     # conv1 (1x1, no bias) + ReLU
    o_ref[...] = jnp.maximum(y * w2, 0.0)     # conv2 (1x1, no bias) + ReLU


def debugnet3_forward(x, w1_flat, w2_flat):
    """x: (N, 1, H, W) float32. Returns (N*H*W, 1), matching x.view(-1, 1)."""
    n = x.shape[0]
    hw = x.shape[1] * x.shape[2] * x.shape[3]
    x2d = x.reshape(n, hw)                    # lane-dense layout for the kernel

    out = pl.pallas_call(
        debugnet3_kernel,
        out_shape=jax.ShapeDtypeStruct((n, hw), jnp.float32),
        in_specs=[
            pl.BlockSpec(memory_space=pltpu.MemorySpace.SMEM),   # conv1 weight (1,)
            pl.BlockSpec(memory_space=pltpu.MemorySpace.SMEM),   # conv2 weight (1,)
            pl.BlockSpec(memory_space=pltpu.MemorySpace.VMEM),   # x, (N, H*W)
        ],
        out_specs=pl.BlockSpec(memory_space=pltpu.MemorySpace.VMEM),
        cost_estimate=pl.CostEstimate(
            flops=4 * n * hw, transcendentals=0, bytes_accessed=2 * n * hw * 4),
    )(w1_flat, w2_flat, x2d)

    # x.view(-1, 1) — pure metadata reshape outside the kernel (kernel output
    # stays lane-dense; a trailing dim of 1 inside the kernel would force
    # fully-masked stores).
    return out.reshape(-1, 1)


def reference_forward_np(x, w1=1.0, w2=1.0):
    """Pure NumPy (float64) reference of DebugNet3.forward."""
    x = np.asarray(x, np.float64)
    y = np.maximum(x * w1, 0.0)    # conv1: 1x1, 1->1 ch, weight w1, no bias
    y = np.maximum(y * w2, 0.0)    # conv2: 1x1, 1->1 ch, weight w2, no bias
    return y.reshape(-1, 1)


if __name__ == "__main__":
    key = jax.random.PRNGKey(0)
    # Small shape consistent with the module: 1 input channel, 16x16 spatial.
    x = jax.random.normal(key, (2, 1, 16, 16), dtype=jnp.float32)

    # Deterministic parameter init matching the module's __init__ (weights = 1.0).
    w1_flat = jnp.ones((1,), jnp.float32)     # conv1.weight, shape (1,1,1,1) flattened
    w2_flat = jnp.ones((1,), jnp.float32)     # conv2.weight, shape (1,1,1,1) flattened

    out = jax.jit(debugnet3_forward)(x, w1_flat, w2_flat)
    out = jax.block_until_ready(out)

    ref = reference_forward_np(np.asarray(x))
    assert out.shape == (2 * 1 * 16 * 16, 1), out.shape
    np.testing.assert_allclose(np.asarray(out), ref, rtol=1e-6, atol=1e-6)
    print("KERNEL_OK")
</pallas_src>

<mosaic_0001>
module attributes {stable_mosaic.version = 11 : i64} {
  func.func @debugnet3_kernel(%arg0: memref<1xf32, #tpu.memory_space<smem>>, %arg1: memref<1xf32, #tpu.memory_space<smem>>, %arg2: memref<2x256xf32, #tpu.memory_space<vmem>>, %arg3: memref<2x256xf32, #tpu.memory_space<vmem>>) attributes {dimension_semantics = [], scalar_prefetch = 0 : i64, scratch_operands = 0 : i64, tpu.core_type = #tpu.core_type<tc>} {
    %c0 = arith.constant 0 : index
    %0 = memref.load %arg0[%c0] : memref<1xf32, #tpu.memory_space<smem>>
    %c0_0 = arith.constant 0 : index
    %1 = memref.load %arg1[%c0_0] : memref<1xf32, #tpu.memory_space<smem>>
    %c0_1 = arith.constant 0 : index
    %c0_2 = arith.constant 0 : index
    %2 = vector.load %arg2[%c0_1, %c0_2] : memref<2x256xf32, #tpu.memory_space<vmem>>, vector<2x256xf32>
    %3 = vector.broadcast %0 : f32 to vector<2x256xf32>
    %4 = arith.mulf %2, %3 : vector<2x256xf32>
    %cst = arith.constant 0.000000e+00 : f32
    %5 = vector.broadcast %cst : f32 to vector<2x256xf32>
    %6 = arith.maximumf %4, %5 : vector<2x256xf32>
    %7 = vector.broadcast %1 : f32 to vector<2x256xf32>
    %8 = arith.mulf %6, %7 : vector<2x256xf32>
    %cst_3 = arith.constant 0.000000e+00 : f32
    %9 = vector.broadcast %cst_3 : f32 to vector<2x256xf32>
    %10 = arith.maximumf %8, %9 : vector<2x256xf32>
    %c0_4 = arith.constant 0 : index
    %c0_5 = arith.constant 0 : index
    %11 = vector.load %arg3[%c0_4, %c0_5] : memref<2x256xf32, #tpu.memory_space<vmem>>, vector<2x256xf32>
    tpu.vector_store %arg3[%c0_4, %c0_5], %10 {strides = array<i32>} : memref<2x256xf32, #tpu.memory_space<vmem>>, vector<2x256xf32>,
    return
  }
}

</mosaic_0001>

<bundles_post_ra>
// kernel: debugnet3_forward.1
= control target key start
LH: loop header
LB: loop body
LE: loop exit
PB: predicated region body
PF: predicated region fallthrough
CT: control target
= control target key end

     0   :  { %s62_s0 = inlined_call_operand.<no memory space> [shape: f32[1], index: 0, kind: input, shape index: {}]   ;;  %s63_s1 = inlined_call_operand.<no memory space> [shape: f32[1], index: 1, kind: input, shape index: {}]   ;;  %s64_s2 = inlined_call_operand.vmem [shape: f32[2,256], index: 2, kind: input, shape index: {}]   ;;  %s65_s3 = inlined_call_operand.vmem [shape: f32[2,256], index: 3, kind: output, shape index: {}]  }
   0x1   :  { %v18_v0 = vld [vmem:[%s64_s2] sm:$0xf]  ;;  %v19_v1 = vstv %s62_s0  ;;  %v22_v3 = vstv %s63_s1 }
   0x2   :  { %v20_v2 = vmul.f32 %v19_v1, %v18_v0 }
   0x4   :  { %v21_v4 = vmax.f32 %v20_v2, 0.0 }
   0x6   :  { %v23_v5 = vmul.f32 %v22_v3, %v21_v4 }
   0x8   :  { %v24_v6 = vmax.f32 %v23_v5, 0.0 }
   0xa   :  { %25 = vst [vmem:[%s65_s3] sm:$0xf] %v24_v6 }

</bundles_post_ra>
